<compile_context>
chip_gen: v6e
topology: v6e:2x2x1
jax: 0.10.0
libtpu: 0.0.40
codegen_flags: <defaults>
</compile_context>

<pallas_src>
import jax
import jax.numpy as jnp
from jax.experimental import pallas as pl
from jax.experimental.pallas import tpu as pltpu


TILE_R_DEFAULT = 512  # rows/grid step: 1 MiB f32 per buffer -> fits v5e/v6e/v7x.


def net_kernel(affine_ref, x_ref, fc_wT_ref, fc_b_ref, o_ref):
    # affine_ref: SMEM f32[4] = [w1, b1, w2, b2]   (conv1/conv2 1x1 scalars)
    # x_ref:      VMEM f32[TILE_R, 512]            (one row tile of the input)
    # fc_wT_ref:  VMEM bf16[512, 512]              (w3 * fc.weight^T, resident)
    # fc_b_ref:   VMEM f32[1, 512]                 (fc.bias + b3 * fc.weight.sum(1))
    # o_ref:      VMEM f32[TILE_R, 512]
    w1 = affine_ref[0]
    b1 = affine_ref[1]
    w2 = affine_ref[2]
    b2 = affine_ref[3]

    x = x_ref[...]
    h = jnp.maximum(x * w1 + b1, 0.0)      # conv1 (1x1, 1->1) + relu   (VPU)
    h = jnp.maximum(h * w2 + b2, 0.0)      # conv2 (1x1, 1->1) + relu   (VPU)
    # conv3 affine is folded into fc_wT_ref / fc_b_ref (see prepare_params).
    y = jnp.dot(h.astype(jnp.bfloat16), fc_wT_ref[...],
                preferred_element_type=jnp.float32)    # bf16 MXU, f32 accum
    o_ref[...] = y + fc_b_ref[...]


def prepare_params(conv_scalars, fc_w, fc_b):
    """One-time parameter prep (kept out of the per-call path).

    Folds conv3's scalar affine into the FC parameters and pre-transposes /
    bf16-casts the weight the kernel consumes:
        (h*w3 + b3) @ W.T + b  ==  h @ (w3 * W.T) + (b + b3 * W.sum(axis=1))
    """
    w1, b1, w2, b2, w3, b3 = (conv_scalars[i] for i in range(6))
    conv_affine = jnp.stack([w1, b1, w2, b2]).astype(jnp.float32)
    fc_wT_eff = (w3 * fc_w.T).astype(jnp.bfloat16)
    fc_b_eff = (fc_b + b3 * jnp.sum(fc_w, axis=1)).astype(jnp.float32).reshape(1, -1)
    return conv_affine, fc_wT_eff, fc_b_eff


def _round_up(n, m):
    return ((n + m - 1) // m) * m


def net_forward(x, conv_affine, fc_wT_eff, fc_b_eff, *, tile_r=TILE_R_DEFAULT):
    """x: (N, 1, H, 512) float32 -> (N, 1, H, 512) float32."""
    N, C, H, W = x.shape
    assert C == 1 and W == 512
    rows = N * C * H

    # Row tile must be a multiple of 8 (f32 sublane); 512 keeps the MXU full
    # and stays ~1 MiB/buffer so double-buffered x+out fit v7x's smaller VMEM.
    tile_r = min(tile_r, _round_up(rows, 8))
    padded_rows = _round_up(rows, tile_r)

    x2 = x.reshape(rows, W)
    if padded_rows != rows:
        x2 = jnp.pad(x2, ((0, padded_rows - rows), (0, 0)))

    grid = (padded_rows // tile_r,)

    out = pl.pallas_call(
        net_kernel,
        out_shape=jax.ShapeDtypeStruct((padded_rows, W), jnp.float32),
        grid=grid,
        in_specs=[
            pl.BlockSpec(memory_space=pltpu.MemorySpace.SMEM),   # conv scalars
            pl.BlockSpec((tile_r, W), lambda i: (i, 0)),         # x row tile
            pl.BlockSpec((W, W), lambda i: (0, 0)),              # fc weight^T (resident)
            pl.BlockSpec((1, W), lambda i: (0, 0)),              # fc bias (resident)
        ],
        out_specs=pl.BlockSpec((tile_r, W), lambda i: (i, 0)),
        compiler_params=pltpu.CompilerParams(
            dimension_semantics=("parallel",),   # shard row tiles across v7x's 2 TCs
        ),
    )(conv_affine, x2, fc_wT_eff, fc_b_eff)

    if padded_rows != rows:
        out = out[:rows]
    return out.reshape(N, C, H, W)


def reference_forward(x, conv_scalars, fc_w, fc_b):
    w1, b1, w2, b2, w3, b3 = (conv_scalars[i] for i in range(6))
    h = jnp.maximum(x * w1 + b1, 0.0)
    h = jnp.maximum(h * w2 + b2, 0.0)
    h = h * w3 + b3
    return jnp.einsum("nchw,ow->ncho", h, fc_w) + fc_b


if __name__ == "__main__":
    key = jax.random.PRNGKey(0)
    k_x, k_c, k_w, k_b = jax.random.split(key, 4)

    # Small shapes consistent with the forward pass (last dim must be 512 for fc).
    N, C, H, W = 2, 1, 8, 512
    x = jax.random.normal(k_x, (N, C, H, W), dtype=jnp.float32)

    # conv1/conv2/conv3 are 1x1 convs with a single in/out channel -> 3 w + 3 b.
    conv_scalars = jax.random.normal(k_c, (6,), dtype=jnp.float32) * 0.5
    fc_w = jax.random.normal(k_w, (512, 512), dtype=jnp.float32) * 0.02
    fc_b = jax.random.normal(k_b, (512,), dtype=jnp.float32) * 0.02

    # One-time parameter prep (transpose / bf16 cast / conv3 folding) outside
    # the per-call path; only the tiled pallas_call runs per forward.
    conv_affine, fc_wT_eff, fc_b_eff = prepare_params(conv_scalars, fc_w, fc_b)

    fwd = jax.jit(net_forward)
    out = fwd(x, conv_affine, fc_wT_eff, fc_b_eff)
    out = jax.block_until_ready(out)

    ref = reference_forward(x, conv_scalars, fc_w, fc_b)
    assert out.shape == (N, C, H, W)
    # bf16 matmul inputs (f32 accumulation) -> slightly looser tolerance vs f32 ref.
    assert jnp.allclose(out, ref, atol=2e-2, rtol=2e-2), (
        float(jnp.max(jnp.abs(out - ref)))
    )

    print("KERNEL_OK")
</pallas_src>

<mosaic_0001>
module attributes {stable_mosaic.version = 11 : i64} {
  func.func @net_kernel(%arg0: i32, %arg1: memref<4xf32, #tpu.memory_space<smem>>, %arg2: memref<16x512xf32, #tpu.memory_space<vmem>>, %arg3: memref<512x512xbf16, #tpu.memory_space<vmem>>, %arg4: memref<1x512xf32, #tpu.memory_space<vmem>>, %arg5: memref<16x512xf32, #tpu.memory_space<vmem>>) attributes {dimension_semantics = [#tpu.dimension_semantics<parallel>], iteration_bounds = array<i64: 1>, scalar_prefetch = 0 : i64, scratch_operands = 0 : i64, tpu.core_type = #tpu.core_type<tc>, window_params = [{transform_indices = @transform_0, window_bounds = array<i64: 4>}, {transform_indices = @transform_1, window_bounds = array<i64: 16, 512>}, {pipeline_mode = #tpu.pipeline_mode<synchronous>, transform_indices = @transform_2, window_bounds = array<i64: 512, 512>}, {pipeline_mode = #tpu.pipeline_mode<synchronous>, transform_indices = @transform_3, window_bounds = array<i64: 1, 512>}, {transform_indices = @transform_4, window_bounds = array<i64: 16, 512>}]} {
    %c0 = arith.constant 0 : index
    %0 = memref.load %arg1[%c0] : memref<4xf32, #tpu.memory_space<smem>>
    %c1 = arith.constant 1 : index
    %1 = memref.load %arg1[%c1] : memref<4xf32, #tpu.memory_space<smem>>
    %c2 = arith.constant 2 : index
    %2 = memref.load %arg1[%c2] : memref<4xf32, #tpu.memory_space<smem>>
    %c3 = arith.constant 3 : index
    %3 = memref.load %arg1[%c3] : memref<4xf32, #tpu.memory_space<smem>>
    %c0_0 = arith.constant 0 : index
    %c0_1 = arith.constant 0 : index
    %4 = vector.load %arg2[%c0_0, %c0_1] : memref<16x512xf32, #tpu.memory_space<vmem>>, vector<16x512xf32>
    %5 = vector.broadcast %0 : f32 to vector<16x512xf32>
    %6 = arith.mulf %4, %5 : vector<16x512xf32>
    %7 = vector.broadcast %1 : f32 to vector<16x512xf32>
    %8 = arith.addf %6, %7 : vector<16x512xf32>
    %cst = arith.constant 0.000000e+00 : f32
    %9 = vector.broadcast %cst : f32 to vector<16x512xf32>
    %10 = arith.maximumf %8, %9 : vector<16x512xf32>
    %11 = vector.broadcast %2 : f32 to vector<16x512xf32>
    %12 = arith.mulf %10, %11 : vector<16x512xf32>
    %13 = vector.broadcast %3 : f32 to vector<16x512xf32>
    %14 = arith.addf %12, %13 : vector<16x512xf32>
    %cst_2 = arith.constant 0.000000e+00 : f32
    %15 = vector.broadcast %cst_2 : f32 to vector<16x512xf32>
    %16 = arith.maximumf %14, %15 : vector<16x512xf32>
    %17 = arith.truncf %16 : vector<16x512xf32> to vector<16x512xbf16>
    %c0_3 = arith.constant 0 : index
    %c0_4 = arith.constant 0 : index
    %18 = vector.load %arg3[%c0_3, %c0_4] : memref<512x512xbf16, #tpu.memory_space<vmem>>, vector<512x512xbf16>
    %cst_5 = arith.constant dense<0.000000e+00> : vector<16x512xf32>
    %19 = tpu.matmul %17, %18, %cst_5 {dimension_numbers = #tpu.dot_dimension_numbers<[1], [0], [0], [1], [0, 0, 1, 1], [], []>} : vector<16x512xbf16>, vector<512x512xbf16>, vector<16x512xf32> -> vector<16x512xf32>
    %c0_6 = arith.constant 0 : index
    %c0_7 = arith.constant 0 : index
    %20 = vector.load %arg4[%c0_6, %c0_7] : memref<1x512xf32, #tpu.memory_space<vmem>>, vector<1x512xf32>
    %21 = vector.broadcast %20 : vector<1x512xf32> to vector<16x512xf32>
    %22 = arith.addf %19, %21 : vector<16x512xf32>
    %c0_8 = arith.constant 0 : index
    %c0_9 = arith.constant 0 : index
    %23 = vector.load %arg5[%c0_8, %c0_9] : memref<16x512xf32, #tpu.memory_space<vmem>>, vector<16x512xf32>
    tpu.vector_store %arg5[%c0_8, %c0_9], %22 {strides = array<i32>} : memref<16x512xf32, #tpu.memory_space<vmem>>, vector<16x512xf32>,
    return
  }
  func.func @transform_0(%arg0: i32) -> i32 {
    %c0_i32 = arith.constant 0 : i32
    %c0_i32_0 = arith.constant 0 : i32
    return %c0_i32 : i32
  }
  func.func @transform_1(%arg0: i32) -> (i32, i32) {
    %c0_i32 = arith.constant 0 : i32
    %c0_i32_0 = arith.constant 0 : i32
    return %arg0, %c0_i32 : i32, i32
  }
  func.func @transform_2(%arg0: i32) -> (i32, i32) {
    %c0_i32 = arith.constant 0 : i32
    %c0_i32_0 = arith.constant 0 : i32
    %c0_i32_1 = arith.constant 0 : i32
    return %c0_i32, %c0_i32_0 : i32, i32
  }
  func.func @transform_3(%arg0: i32) -> (i32, i32) {
    %c0_i32 = arith.constant 0 : i32
    %c0_i32_0 = arith.constant 0 : i32
    %c0_i32_1 = arith.constant 0 : i32
    return %c0_i32, %c0_i32_0 : i32, i32
  }
  func.func @transform_4(%arg0: i32) -> (i32, i32) {
    %c0_i32 = arith.constant 0 : i32
    %c0_i32_0 = arith.constant 0 : i32
    return %arg0, %c0_i32 : i32, i32
  }
}

</mosaic_0001>

<bundles_post_ra>
// kernel: net_forward.1
= control target key start
LH: loop header
LB: loop body
LE: loop exit
PB: predicated region body
PF: predicated region fallthrough
CT: control target
= control target key end

     0   :  { %9 = vsyncpa [#allocation5], 0  ;;  %s1595_s0 = inlined_call_operand.vmem [shape: f32[4], index: 0, kind: input, shape index: {}]   ;;  %s1596_s1 = inlined_call_operand.hbm [shape: f32[16,512], index: 1, kind: input, shape index: {}]   ;;  %s1597_s2 = inlined_call_operand.hbm [shape: bf16[512,512], index: 2, kind: input, shape index: {}]   ;;  %s1598_s3 = inlined_call_operand.vmem [shape: f32[1,512], index: 3, kind: input, shape index: {}]   ;;  %s1599_s4 = inlined_call_operand.hbm [shape: f32[16,512], index: 4, kind: output, shape index: {}]  }
   0x1   :  { %10 = vsyncpa [#allocation3], 0 }
   0x2   :  { %11 = vsyncpa [#allocation8], 0 }
   0x3   :  { %12 = vsyncpa [#allocation4], 0  ;;  %s19_s17 = sshll.u32 %s1595_s0, 4  ;;  %s20_s17 = int_to_ptr.vmem [resolvable:$true] %s19_s17 }
   0x4   :  { %s1447_s18 = scalar_lea.vmem %s20_s17, 16  ;;  %p1452_p1 = scmp.lt.s32.totalorder %s20_s17, %s20_s17 }
   0x5   :  { %p1448_p0 = scmp.ne.s32.totalorder %s20_s17, %s1447_s18  ;;  %p1453_p2 = scmp.lt.s32.totalorder %s1447_s18, %s1447_s18 }
   0x7   :  { %p1454_p3 = por %p1453_p2, %p1452_p1 }
   0x9   :  { %p1455_p4 = pnand %p1454_p3, %p1448_p0 }
   0xb   :  { %1458 = shalt.err (!%p1455_p4)
}
   0xc   :  { %s1527_s19 = smov [#allocation2]   ;;  %s1528_s20 = smov [#allocation6]  }
   0xd   :  { %22 = dma.vmem_to_smem %s20_s17, 16, %s1527_s19, [#allocation5]  }
   0xe   :  { %s28_s21 = sshll.u32 %s1528_s20, 4  ;;  %s29_s21 = int_to_ptr.vmem [resolvable:$true] %s28_s21 }
   0xf   :  { %s1467_s22 = scalar_lea.vmem %s29_s21, 1024  ;;  %p1472_p6 = scmp.lt.s32.totalorder %s29_s21, %s29_s21 }
  0x10   :  { %p1468_p5 = scmp.ne.s32.totalorder %s29_s21, %s1467_s22  ;;  %p1473_p7 = scmp.lt.s32.totalorder %s1467_s22, %s1467_s22 }
  0x12   :  { %p1474_p8 = por %p1473_p7, %p1472_p6 }
  0x14   :  { %p1475_p9 = pnand %p1474_p8, %p1468_p5 }
  0x16   :  { %1478 = shalt.err (!%p1475_p9)
}
  0x17   :  { %s1529_s0 = smov 512   ;;  %s1530_s23 = smov 32  }
  0x18   :  { %34 = dma.hbm_to_vmem [thread:$0]  %s1596_s1, 1024, %s29_s21, [#allocation3], %s1529_s0, %s1529_s0, %s1530_s23  }
  0x19   :  { %s1531_s26 = smov [#allocation7]  }
  0x1a   :  { %s40_s27 = sshll.u32 %s1531_s26, 4  ;;  %s41_s27 = int_to_ptr.vmem [resolvable:$true] %s40_s27 }
  0x1b   :  { %s1487_s28 = scalar_lea.vmem %s41_s27, 16384  ;;  %p1492_p11 = scmp.lt.s32.totalorder %s41_s27, %s41_s27 }
  0x1c   :  { %p1488_p10 = scmp.ne.s32.totalorder %s41_s27, %s1487_s28  ;;  %p1493_p12 = scmp.lt.s32.totalorder %s1487_s28, %s1487_s28 }
  0x1e   :  { %p1494_p13 = por %p1493_p12, %p1492_p11 }
  0x20   :  { %p1495_p0 = pnand %p1494_p13, %p1488_p10 }
  0x22   :  { %1498 = shalt.err (!%p1495_p0)
}
  0x23   :  { %s1532_s29 = smov 256   ;;  %s1533_s30 = smov 16  }
  0x24   :  { %46 = dma.hbm_to_vmem [thread:$0]  %s1597_s2, 16384, %s41_s27, [#allocation8], %s1532_s29, %s1532_s29, %s1533_s30  }
  0x25   :  { %1519 = dma.done.wait [#allocation5], 16  }
  0x26   :  { %1520 = vsyncadd [#allocation5], 4294967280 }
  0x27   :  { %1521 = dma.done.wait [#allocation3], 1024  }
  0x28   :  { %1522 = vsyncadd [#allocation3], 4294966272 }
  0x29   :  { %1523 = dma.done.wait [#allocation8], 16384  }
  0x2a   :  { %1524 = vsyncadd [#allocation8], 4294950912 }
  0x2b   :  { %58 = sfence }
  0x2c   :  { %v1255_v0 = vld [vmem:[#allocation7 + $0xe4] ss:$16 sps:$4 sm:$0xff]   ;;  %v1259_v2 = vld [vmem:[#allocation7 + $0xe0] ss:$16 sps:$4 sm:$0xff]   ;;  %s59_s1 = sld [smem:[#allocation2]]  ;;  %v64_v49 = vld [vmem:[#allocation6 + $0x8] sm:$0xff] }
  0x2d   :  { %v1257_v1 = vld [vmem:[#allocation7 + $0x2e4] ss:$16 sps:$4 sm:$0xff]   ;;  %917 = vmatprep.subr.bf16.mxu0 %v1255_v0  ;;  %v1260_v3 = vld [vmem:[#allocation7 + $0x2e0] ss:$16 sps:$4 sm:$0xff]   ;;  %s1116_s2 = sld [smem:[#allocation2 + $0x1]]  ;;  %v68_v53 = vld [vmem:[#allocation6 + $0x28] sm:$0xff] }
  0x2e   :  { %960 = vmatprep.subr.bf16.mxu1 %v1257_v1  ;;  %v1261_v4 = vld [vmem:[#allocation7 + $0xc4] ss:$16 sps:$4 sm:$0xff]   ;;  %918 = vmatpush1.bf16.msra.mxu0 %v1259_v2  ;;  %v1265_v6 = vld [vmem:[#allocation7 + $0xc0] ss:$16 sps:$4 sm:$0xff]   ;;  %s1572_s7 = sld [smem:[#allocation2 + $0x2]]  ;;  %v66_v55 = vld [vmem:[#allocation6 + $0x18] sm:$0xff] }
  0x2f   :  { %961 = vmatpush1.bf16.msra.mxu1 %v1260_v3  ;;  %v1263_v5 = vld [vmem:[#allocation7 + $0x2c4] ss:$16 sps:$4 sm:$0xff]   ;;  %919 = vmatprep.subr.bf16.mxu0 %v1261_v4  ;;  %v1266_v7 = vld [vmem:[#allocation7 + $0x2c0] ss:$16 sps:$4 sm:$0xff]   ;;  %s1574_s8 = sld [smem:[#allocation2 + $0x3]]  ;;  %v70_v56 = vld [vmem:[#allocation6 + $0x38] sm:$0xff] }
  0x30   :  { %962 = vmatprep.subr.bf16.mxu1 %v1263_v5  ;;  %v1267_v8 = vld [vmem:[#allocation7 + $0xa4] ss:$16 sps:$4 sm:$0xff]   ;;  %v1271_v10 = vld [vmem:[#allocation7 + $0xa0] ss:$16 sps:$4 sm:$0xff]  }
  0x31   :  { %v1269_v9 = vld [vmem:[#allocation7 + $0x2a4] ss:$16 sps:$4 sm:$0xff]   ;;  %v1272_v11 = vld [vmem:[#allocation7 + $0x2a0] ss:$16 sps:$4 sm:$0xff]  }
  0x32   :  { %920 = vmatpush1.bf16.msra.mxu0 %v1265_v6  ;;  %v1273_v12 = vld [vmem:[#allocation7 + $0x84] ss:$16 sps:$4 sm:$0xff]   ;;  %v1277_v14 = vld [vmem:[#allocation7 + $0x80] ss:$16 sps:$4 sm:$0xff]   ;;  %v71_v45 = vstv %s59_s1 }
  0x33   :  { %963 = vmatpush1.bf16.msra.mxu1 %v1266_v7  ;;  %921 = vmatprep.subr.bf16.mxu0 %v1267_v8  ;;  %v1275_v13 = vld [vmem:[#allocation7 + $0x284] ss:$16 sps:$4 sm:$0xff]   ;;  %v1278_v15 = vld [vmem:[#allocation7 + $0x280] ss:$16 sps:$4 sm:$0xff]   ;;  %v80_v50 = vstv %s1116_s2  ;;  %v73_v54 = vmul.f32 %v71_v45, %v64_v49  ;;  %v77_v57 = vmul.f32 %v71_v45, %v68_v53  ;;  %v75_v59 = vmul.f32 %v71_v45, %v66_v55 }
  0x34   :  { %964 = vmatprep.subr.bf16.mxu1 %v1269_v9  ;;  %v1279_v16 = vld [vmem:[#allocation7 + $0x64] ss:$16 sps:$4 sm:$0xff]   ;;  %v1283_v18 = vld [vmem:[#allocation7 + $0x60] ss:$16 sps:$4 sm:$0xff]   ;;  %v97_v58 = vstv %s1572_s7  ;;  %v79_v60 = vmul.f32 %v71_v45, %v70_v56 }
  0x35   :  { %v1281_v17 = vld [vmem:[#allocation7 + $0x264] ss:$16 sps:$4 sm:$0xff]   ;;  %v1284_v19 = vld [vmem:[#allocation7 + $0x260] ss:$16 sps:$4 sm:$0xff]   ;;  %v82_v0 = vadd.f32 %v80_v50, %v73_v54  ;;  %v106_v1 = vstv %s1574_s8  ;;  %v86_v5 = vadd.f32 %v80_v50, %v77_v57  ;;  %v84_v6 = vadd.f32 %v80_v50, %v75_v59 }
  0x36   :  { %922 = vmatpush1.bf16.msra.mxu0 %v1271_v10  ;;  %v1285_v20 = vld [vmem:[#allocation7 + $0x44] ss:$16 sps:$4 sm:$0xff]   ;;  %v1289_v22 = vld [vmem:[#allocation7 + $0x40] ss:$16 sps:$4 sm:$0xff]   ;;  %v88_v7 = vadd.f32 %v80_v50, %v79_v60 }
  0x37   :  { %965 = vmatpush1.bf16.msra.mxu1 %v1272_v11  ;;  %923 = vmatprep.subr.bf16.mxu0 %v1273_v12  ;;  %v1287_v21 = vld [vmem:[#allocation7 + $0x244] ss:$16 sps:$4 sm:$0xff]   ;;  %v1290_v23 = vld [vmem:[#allocation7 + $0x240] ss:$16 sps:$4 sm:$0xff]   ;;  %v90_v11 = vmax.f32 %v82_v0, 0.0 }
  0x38   :  { %966 = vmatprep.subr.bf16.mxu1 %v1275_v13  ;;  %v1291_v24 = vld [vmem:[#allocation7 + $0x24] ss:$16 sps:$4 sm:$0xff]   ;;  %v1295_v26 = vld [vmem:[#allocation7 + $0x20] ss:$16 sps:$4 sm:$0xff]  }
  0x39   :  { %v1293_v25 = vld [vmem:[#allocation7 + $0x224] ss:$16 sps:$4 sm:$0xff]   ;;  %v1296_v27 = vld [vmem:[#allocation7 + $0x220] ss:$16 sps:$4 sm:$0xff]  }
  0x3a   :  { %924 = vmatpush1.bf16.msra.mxu0 %v1277_v14  ;;  %v1297_v28 = vld [vmem:[#allocation7 + $0x4] ss:$16 sps:$4 sm:$0xff]   ;;  %v1301_v30 = vld [vmem:[#allocation7] ss:$16 sps:$4 sm:$0xff]  }
  0x3b   :  { %967 = vmatpush1.bf16.msra.mxu1 %v1278_v15  ;;  %925 = vmatprep.subr.bf16.mxu0 %v1279_v16  ;;  %v1299_v29 = vld [vmem:[#allocation7 + $0x204] ss:$16 sps:$4 sm:$0xff]   ;;  %v1302_v31 = vld [vmem:[#allocation7 + $0x200] ss:$16 sps:$4 sm:$0xff]   ;;  %v94_v15 = vmax.f32 %v86_v5, 0.0  ;;  %v92_v16 = vmax.f32 %v84_v6, 0.0 }
  0x3c   :  { %968 = vmatprep.subr.bf16.mxu1 %v1281_v17  ;;  %v1303_v32 = vld [vmem:[#allocation7 + $0x1e4] ss:$16 sps:$4 sm:$0xff]   ;;  %v1307_v34 = vld [vmem:[#allocation7 + $0x1e0] ss:$16 sps:$4 sm:$0xff]   ;;  %v96_v17 = vmax.f32 %v88_v7, 0.0 }
  0x3d   :  { %v1305_v33 = vld [vmem:[#allocation7 + $0x3e4] ss:$16 sps:$4 sm:$0xff]   ;;  %v1308_v35 = vld [vmem:[#allocation7 + $0x3e0] ss:$16 sps:$4 sm:$0xff]   ;;  %v1362_v5 = vld [vmem:[#allocation7 + $0x2cc] ss:$16 sps:$4 sm:$0xff]  }
  0x3e   :  { %926 = vmatpush1.bf16.msra.mxu0 %v1283_v18  ;;  %v1309_v36 = vld [vmem:[#allocation7 + $0x1c4] ss:$16 sps:$4 sm:$0xff]   ;;  %v1313_v38 = vld [vmem:[#allocation7 + $0x1c0] ss:$16 sps:$4 sm:$0xff]   ;;  %v1357_v6 = vld [vmem:[#allocation7 + $0xc8] ss:$16 sps:$4 sm:$0xff]  }
  0x3f   :  { %969 = vmatpush1.bf16.msra.mxu1 %v1284_v19  ;;  %927 = vmatprep.subr.bf16.mxu0 %v1285_v20  ;;  %v1311_v37 = vld [vmem:[#allocation7 + $0x3c4] ss:$16 sps:$4 sm:$0xff]   ;;  %v1314_v39 = vld [vmem:[#allocation7 + $0x3c0] ss:$16 sps:$4 sm:$0xff]   ;;  %v1360_v7 = vld [vmem:[#allocation7 + $0x2c8] ss:$16 sps:$4 sm:$0xff]  }
  0x40   :  { %970 = vmatprep.subr.bf16.mxu1 %v1287_v21  ;;  %v1315_v40 = vld [vmem:[#allocation7 + $0x1a4] ss:$16 sps:$4 sm:$0xff]   ;;  %v1319_v42 = vld [vmem:[#allocation7 + $0x1a0] ss:$16 sps:$4 sm:$0xff]   ;;  %v99_v21 = vmul.f32 %v97_v58, %v90_v11  ;;  %v1366_v11 = vld [vmem:[#allocation7 + $0x2a8] ss:$16 sps:$4 sm:$0xff]  }
  0x41   :  { %v1317_v41 = vld [vmem:[#allocation7 + $0x3a4] ss:$16 sps:$4 sm:$0xff]   ;;  %v1320_v43 = vld [vmem:[#allocation7 + $0x3a0] ss:$16 sps:$4 sm:$0xff]  }
  0x42   :  { %928 = vmatpush1.bf16.msra.mxu0 %v1289_v22  ;;  %v1321_v44 = vld [vmem:[#allocation7 + $0x184] ss:$16 sps:$4 sm:$0xff]   ;;  %v1325_v47 = vld [vmem:[#allocation7 + $0x180] ss:$16 sps:$4 sm:$0xff]  }
  0x43   :  { %971 = vmatpush1.bf16.msra.mxu1 %v1290_v23  ;;  %929 = vmatprep.subr.bf16.mxu0 %v1291_v24  ;;  %v1323_v46 = vld [vmem:[#allocation7 + $0x384] ss:$16 sps:$4 sm:$0xff]   ;;  %v1326_v48 = vld [vmem:[#allocation7 + $0x380] ss:$16 sps:$4 sm:$0xff]  }
  0x44   :  { %972 = vmatprep.subr.bf16.mxu1 %v1293_v25  ;;  %v1327_v51 = vld [vmem:[#allocation7 + $0x164] ss:$16 sps:$4 sm:$0xff]   ;;  %v1331_v9 = vld [vmem:[#allocation7 + $0x160] ss:$16 sps:$4 sm:$0xff]   ;;  %v103_v25 = vmul.f32 %v97_v58, %v94_v15  ;;  %v1372_v15 = vld [vmem:[#allocation7 + $0x288] ss:$16 sps:$4 sm:$0xff]  }
  0x45   :  { %v1329_v52 = vld [vmem:[#allocation7 + $0x364] ss:$16 sps:$4 sm:$0xff]   ;;  %v1332_v10 = vld [vmem:[#allocation7 + $0x360] ss:$16 sps:$4 sm:$0xff]  }
  0x46   :  { %930 = vmatpush1.bf16.msra.mxu0 %v1295_v26  ;;  %v63_v61 = vld [vmem:[#allocation6] sm:$0xff]  ;;  %v65_v63 = vld [vmem:[#allocation6 + $0x10] sm:$0xff]  ;;  %v101_v26 = vmul.f32 %v97_v58, %v92_v16  ;;  %v1377_v16 = vld [vmem:[#allocation7 + $0x6c] ss:$16 sps:$4 sm:$0xff]  }
  0x47   :  { %973 = vmatpush1.bf16.msra.mxu1 %v1296_v27  ;;  %931 = vmatprep.subr.bf16.mxu0 %v1297_v28  ;;  %v67_v62 = vld [vmem:[#allocation6 + $0x20] sm:$0xff]  ;;  %v72_v2 = vmul.f32 %v71_v45, %v63_v61  ;;  %v69_v4 = vld [vmem:[#allocation6 + $0x30] sm:$0xff]  ;;  %v74_v8 = vmul.f32 %v71_v45, %v65_v63  ;;  %v105_v27 = vmul.f32 %v97_v58, %v96_v17  ;;  %v1356_v63 = vld [vmem:[#allocation7 + $0x2ec] ss:$16 sps:$4 sm:$0xff]  }
  0x48   :  { %974 = vmatprep.subr.bf16.mxu1 %v1299_v29  ;;  %v76_v3 = vmul.f32 %v71_v45, %v67_v62  ;;  %v78_v14 = vmul.f32 %v71_v45, %v69_v4  ;;  %v1333_v19 = vld [vmem:[#allocation7 + $0x144] ss:$16 sps:$4 sm:$0xff]   ;;  %v1337_v29 = vld [vmem:[#allocation7 + $0x140] ss:$16 sps:$4 sm:$0xff]   ;;  %v1353_v62 = vld [vmem:[#allocation7 + $0xec] ss:$16 sps:$4 sm:$0xff]  }
  0x49   :  { %v81_v12 = vadd.f32 %v80_v50, %v72_v2  ;;  %v83_v18 = vadd.f32 %v80_v50, %v74_v8  ;;  %v1335_v20 = vld [vmem:[#allocation7 + $0x344] ss:$16 sps:$4 sm:$0xff]   ;;  %v1343_v49 = vld [vmem:[#allocation7 + $0x120] ss:$16 sps:$4 sm:$0xff]   ;;  %v1351_v2 = vld [vmem:[#allocation7 + $0xe8] ss:$16 sps:$4 sm:$0xff]  }
  0x4a   :  { %932 = vmatpush1.bf16.msra.mxu0 %v1301_v30  ;;  %v85_v13 = vadd.f32 %v80_v50, %v76_v3  ;;  %v87_v24 = vadd.f32 %v80_v50, %v78_v14  ;;  %v108_v30 = vadd.f32 %v106_v1, %v99_v21  ;;  %v1344_v50 = vld [vmem:[#allocation7 + $0x320] ss:$16 sps:$4 sm:$0xff]   ;;  %v1345_v54 = vld [vmem:[#allocation7 + $0x104] ss:$16 sps:$4 sm:$0xff]   ;;  %v1354_v3 = vld [vmem:[#allocation7 + $0x2e8] ss:$16 sps:$4 sm:$0xff]  }
  0x4b   :  { %975 = vmatpush1.bf16.msra.mxu1 %v1302_v31  ;;  %933 = vmatprep.subr.bf16.mxu0 %v1303_v32  ;;  %v89_v22 = vmax.f32 %v81_v12, 0.0  ;;  %v91_v28 = vmax.f32 %v83_v18, 0.0  ;;  %v1347_v55 = vld [vmem:[#allocation7 + $0x304] ss:$16 sps:$4 sm:$0xff]   ;;  %v1349_v60 = vld [vmem:[#allocation7 + $0x100] ss:$16 sps:$4 sm:$0xff]  }
  0x4c   :  { %976 = vmatprep.subr.bf16.mxu1 %v1305_v33  ;;  %v93_v23 = vmax.f32 %v85_v13, 0.0  ;;  %v95_v33 = vmax.f32 %v87_v24, 0.0  ;;  %v1350_v61 = vld [vmem:[#allocation7 + $0x300] ss:$16 sps:$4 sm:$0xff]   ;;  %v1359_v4 = vld [vmem:[#allocation7 + $0xcc] ss:$16 sps:$4 sm:$0xff]  }
  0x4d   :  { %v98_v31 = vmul.f32 %v97_v58, %v89_v22  ;;  %v1365_v8 = vld [vmem:[#allocation7 + $0xac] ss:$16 sps:$4 sm:$0xff]   ;;  %v1369_v14 = vld [vmem:[#allocation7 + $0x88] ss:$16 sps:$4 sm:$0xff]  }
  0x4e   :  { %934 = vmatpush2.bf16.msra.mxu0 %v1307_v34  ;;  %v102_v32 = vmul.f32 %v97_v58, %v93_v23  ;;  %v1338_v34 = vld [vmem:[#allocation7 + $0x340] ss:$16 sps:$4 sm:$0xff]   ;;  %v104_v45 = vmul.f32 %v97_v58, %v95_v33  ;;  %v1371_v12 = vld [vmem:[#allocation7 + $0x8c] ss:$16 sps:$4 sm:$0xff]   ;;  %v1375_v18 = vld [vmem:[#allocation7 + $0x68] ss:$16 sps:$4 sm:$0xff]  }
  0x4f   :  { %977 = vmatpush2.bf16.msra.mxu1 %v1308_v35  ;;  %935 = vmatprep.subr.bf16.mxu0 %v1309_v36  ;;  %v112_v35 = vadd.f32 %v106_v1, %v103_v25  ;;  %v110_v36 = vadd.f32 %v106_v1, %v101_v26  ;;  %v1374_v13 = vld [vmem:[#allocation7 + $0x28c] ss:$16 sps:$4 sm:$0xff]   ;;  %v1381_v22 = vld [vmem:[#allocation7 + $0x48] ss:$16 sps:$4 sm:$0xff]  }
  0x50   :  { %978 = vmatprep.subr.bf16.mxu1 %v1311_v37  ;;  %v114_v37 = vadd.f32 %v106_v1, %v105_v27  ;;  %v113_v53 = vadd.f32 %v106_v1, %v104_v45  ;;  %v1380_v17 = vld [vmem:[#allocation7 + $0x26c] ss:$16 sps:$4 sm:$0xff]   ;;  %v1384_v23 = vld [vmem:[#allocation7 + $0x248] ss:$16 sps:$4 sm:$0xff]  }
  0x51   :  { %v1386_v21 = vld [vmem:[#allocation7 + $0x24c] ss:$16 sps:$4 sm:$0xff]   ;;  %v1387_v26 = vld [vmem:[#allocation7 + $0x28] ss:$16 sps:$4 sm:$0xff]  }
  0x52   :  { %936 = vmatpush2.bf16.msra.mxu0 %v1313_v38  ;;  %v1339_v38 = vld [vmem:[#allocation7 + $0x124] ss:$16 sps:$4 sm:$0xff]   ;;  %v1389_v24 = vld [vmem:[#allocation7 + $0x2c] ss:$16 sps:$4 sm:$0xff]   ;;  %v1390_v27 = vld [vmem:[#allocation7 + $0x228] ss:$16 sps:$4 sm:$0xff]  }
  0x53   :  { %979 = vmatpush2.bf16.msra.mxu1 %v1314_v39  ;;  %937 = vmatprep.subr.bf16.mxu0 %v1315_v40  ;;  %v1341_v39 = vld [vmem:[#allocation7 + $0x324] ss:$16 sps:$4 sm:$0xff]   ;;  %v116_v40 = vmax.f32 %v108_v30, 0.0  ;;  %v1392_v25 = vld [vmem:[#allocation7 + $0x22c] ss:$16 sps:$4 sm:$0xff]  }
  0x54   :  { %980 = vmatprep.subr.bf16.mxu1 %v1317_v41  ;;  %v100_v41 = vmul.f32 %v97_v58, %v91_v28  ;;  %v121_v58 = vmax.f32 %v113_v53, 0.0  ;;  %v1395_v28 = vld [vmem:[#allocation7 + $0xc] ss:$16 sps:$4 sm:$0xff]   ;;  %v1393_v30 = vld [vmem:[#allocation7 + $0x8] ss:$16 sps:$4 sm:$0xff]  }
  0x55   :  { %v1404_v33 = vld [vmem:[#allocation7 + $0x3ec] ss:$16 sps:$4 sm:$0xff]  }
  0x56   :  { %938 = vmatpush2.bf16.msra.mxu0 %v1319_v42  ;;  %v120_v42 = vmax.f32 %v112_v35, 0.0  ;;  %v1402_v35 = vld [vmem:[#allocation7 + $0x3e8] ss:$16 sps:$4 sm:$0xff]   ;;  %v1422_v45 = vld [vmem:[#allocation7 + $0x38c] ss:$16 sps:$4 sm:$0xff]  }
  0x57   :  { %981 = vmatpush2.bf16.msra.mxu1 %v1320_v43  ;;  %939 = vmatprep.subr.bf16.mxu0 %v1321_v44  ;;  %v118_v43 = vmax.f32 %v110_v36, 0.0  ;;  %v122_v44 = vmax.f32 %v114_v37, 0.0  ;;  %v1407_v36 = vld [vmem:[#allocation7 + $0x1cc] ss:$16 sps:$4 sm:$0xff]  }
  0x58   :  { %982 = vmatprep.subr.bf16.mxu1 %v1323_v46  ;;  %v107_v46 = vadd.f32 %v106_v1, %v98_v31  ;;  %v1396_v31 = vld [vmem:[#allocation7 + $0x208] ss:$16 sps:$4 sm:$0xff]   ;;  %v1410_v37 = vld [vmem:[#allocation7 + $0x3cc] ss:$16 sps:$4 sm:$0xff]  }
  0x59   :  { %v1434_v53 = vld [vmem:[#allocation7 + $0x34c] ss:$16 sps:$4 sm:$0xff]  }
  0x5a   :  { %940 = vmatpush2.bf16.msra.mxu0 %v1325_v47  ;;  %v111_v47 = vadd.f32 %v106_v1, %v102_v32  ;;  %v115_v56 = vmax.f32 %v107_v46, 0.0  ;;  %v1401_v32 = vld [vmem:[#allocation7 + $0x1ec] ss:$16 sps:$4 sm:$0xff]   ;;  %v1417_v46 = vld [vmem:[#allocation7 + $0x188] ss:$16 sps:$4 sm:$0xff]  }
  0x5b   :  { %983 = vmatpush2.bf16.msra.mxu1 %v1326_v48  ;;  %941 = vmatprep.subr.bf16.mxu0 %v1327_v51  ;;  %v109_v48 = vadd.f32 %v106_v1, %v100_v41  ;;  %v124_v51 = vpack.c.bf16 %v120_v42, %v116_v40  ;;  %v1413_v40 = vld [vmem:[#allocation7 + $0x1ac] ss:$16 sps:$4 sm:$0xff]   ;;  %v1411_v42 = vld [vmem:[#allocation7 + $0x1a8] ss:$16 sps:$4 sm:$0xff]  }
  0x5c   :  { %984 = vmatprep.subr.bf16.mxu1 %v1329_v52  ;;  %v126_v52 = vpack.c.bf16 %v122_v44, %v118_v43  ;;  %v119_v57 = vmax.f32 %v111_v47, 0.0  ;;  %v1416_v41 = vld [vmem:[#allocation7 + $0x3ac] ss:$16 sps:$4 sm:$0xff]   ;;  %v1414_v43 = vld [vmem:[#allocation7 + $0x3a8] ss:$16 sps:$4 sm:$0xff]  }
  0x5d   :  { %949 = vmatprep.mubr.bf16.mxu0 %v124_v51  ;;  %v117_v59 = vmax.f32 %v109_v48, 0.0  ;;  %v1419_v44 = vld [vmem:[#allocation7 + $0x18c] ss:$16 sps:$4 sm:$0xff]   ;;  %v1420_v47 = vld [vmem:[#allocation7 + $0x388] ss:$16 sps:$4 sm:$0xff]  }
  0x5e   :  { %942 = vmatpush2.bf16.msra.mxu0 %v1331_v9  ;;  %992 = vmatprep.mubr.bf16.mxu1 %v126_v52  ;;  %v1578_v0 = vpack.c.bf16 %v119_v57, %v115_v56  ;;  %v1368_v9 = vld [vmem:[#allocation7 + $0x2ac] ss:$16 sps:$4 sm:$0xff]  }
  0x5f   :  { %985 = vmatpush2.bf16.msra.mxu1 %v1332_v10  ;;  %943 = vmatprep.subr.bf16.mxu0 %v1333_v19  ;;  %v1580_v1 = vpack.c.bf16 %v121_v58, %v117_v59  ;;  %v1363_v10 = vld [vmem:[#allocation7 + $0xa8] ss:$16 sps:$4 sm:$0xff]   ;;  %v1425_v48 = vld [vmem:[#allocation7 + $0x16c] ss:$16 sps:$4 sm:$0xff]  }
  0x60   :  { %986 = vmatprep.subr.bf16.mxu1 %v1335_v20  ;;  %v1378_v19 = vld [vmem:[#allocation7 + $0x268] ss:$16 sps:$4 sm:$0xff]   ;;  %v1383_v20 = vld [vmem:[#allocation7 + $0x4c] ss:$16 sps:$4 sm:$0xff]  }
  0x61   :  { %v1437_v56 = vld [vmem:[#allocation7 + $0x12c] ss:$16 sps:$4 sm:$0xff]   ;;  %v1435_v59 = vld [vmem:[#allocation7 + $0x128] ss:$16 sps:$4 sm:$0xff]  }
  0x62   :  { %944 = vmatpush2.bf16.msra.mxu0 %v1337_v29  ;;  %v1398_v29 = vld [vmem:[#allocation7 + $0x20c] ss:$16 sps:$4 sm:$0xff]   ;;  %v1438_v58 = vld [vmem:[#allocation7 + $0x328] ss:$16 sps:$4 sm:$0xff]  }
  0x63   :  { %987 = vmatpush2.bf16.msra.mxu1 %v1338_v34  ;;  %945 = vmatprep.subr.bf16.mxu0 %v1339_v38  ;;  %v1399_v34 = vld [vmem:[#allocation7 + $0x1e8] ss:$16 sps:$4 sm:$0xff]   ;;  %v1440_v57 = vld [vmem:[#allocation7 + $0x32c] ss:$16 sps:$4 sm:$0xff]  }
  0x64   :  { %988 = vmatprep.subr.bf16.mxu1 %v1341_v39  ;;  %v1405_v38 = vld [vmem:[#allocation7 + $0x1c8] ss:$16 sps:$4 sm:$0xff]  }
  0x65   :  { %v1408_v39 = vld [vmem:[#allocation7 + $0x3c8] ss:$16 sps:$4 sm:$0xff]  }
  0x66   :  { %946 = vmatpush2.bf16.msra.mxu0 %v1343_v49  ;;  %v1428_v49 = vld [vmem:[#allocation7 + $0x36c] ss:$16 sps:$4 sm:$0xff]  }
  0x67   :  { %989 = vmatpush2.bf16.msra.mxu1 %v1344_v50  ;;  %947 = vmatprep.subr.bf16.mxu0 %v1345_v54  ;;  %v1423_v50 = vld [vmem:[#allocation7 + $0x168] ss:$16 sps:$4 sm:$0xff]  }
  0x68   :  { %990 = vmatprep.subr.bf16.mxu1 %v1347_v55  ;;  %v1429_v54 = vld [vmem:[#allocation7 + $0x148] ss:$16 sps:$4 sm:$0xff]  }
  0x69   :  { %v1432_v55 = vld [vmem:[#allocation7 + $0x348] ss:$16 sps:$4 sm:$0xff]  }
  0x6a   :  { %948 = vmatpush2.bf16.msra.mxu0 %v1349_v60  ;;  %v1443_v60 = vld [vmem:[#allocation7 + $0x10c] ss:$16 sps:$4 sm:$0xff]  }
  0x6b   :  { %991 = vmatpush2.bf16.msra.mxu1 %v1350_v61  ;;  %1003 = vmatprep.subr.bf16.mxu0 %v1353_v62  ;;  %v1446_v61 = vld [vmem:[#allocation7 + $0x30c] ss:$16 sps:$4 sm:$0xff]   ;;  %v1441_v62 = vld [vmem:[#allocation7 + $0x108] ss:$16 sps:$4 sm:$0xff]  }
  0x6c   :  { %1046 = vmatprep.subr.bf16.mxu1 %v1356_v63  ;;  %v1444_v63 = vld [vmem:[#allocation7 + $0x308] ss:$16 sps:$4 sm:$0xff]  }
  0x6d   :  { %950 = vmatmul.mubr.bf16.vlgmr.msra.gmra.mxu0 %v1578_v0 }
  0x6e   :  { %993 = vmatmul.mubr.bf16.vlgmr.msra.gmra.mxu1 %v1580_v1  ;;  %1004 = vmatpush1.bf16.msra.mxu0 %v1351_v2  ;;  %v257_v2 = vlaneseq }
  0x6f   :  { %1047 = vmatpush1.bf16.msra.mxu1 %v1354_v3  ;;  %1005 = vmatprep.subr.bf16.mxu0 %v1359_v4 }
  0x70   :  { %1048 = vmatprep.subr.bf16.mxu1 %v1362_v5  ;;  %1035 = vmatprep.mubr.bf16.mxu0 %v124_v51  ;;  %v1426_v51 = vld [vmem:[#allocation7 + $0x368] ss:$16 sps:$4 sm:$0xff]   ;;  %v258_v3 = vshrl.u32 %v257_v2, 7  ;;  %v255_v5 = vld [vmem:[%s1598_s3] sm:$0xf]  ;;  %s1534_s3 = smov [#allocation9]  }
  0x71   :  { %1078 = vmatprep.mubr.bf16.mxu1 %v126_v52  ;;  %v1431_v52 = vld [vmem:[#allocation7 + $0x14c] ss:$16 sps:$4 sm:$0xff]   ;;  %s1102_s11 = sshll.u32 %s1534_s3, 4  ;;  %s1103_s11 = int_to_ptr.vmem [resolvable:$true] %s1102_s11 }
  0x72   :  { %1006 = vmatpush1.bf16.msra.mxu0 %v1357_v6  ;;  %v259_v4 = vsub.s32 0, %v258_v3  ;;  %v263_v6 = vsub.s32 1, %v258_v3  ;;  %s1499_s12 = scalar_lea.vmem %s1103_s11, 1024  ;;  %p1504_p2 = scmp.lt.s32.totalorder %s1103_s11, %s1103_s11 }
  0x73   :  { %1049 = vmatpush1.bf16.msra.mxu1 %v1360_v7  ;;  %1007 = vmatprep.subr.bf16.mxu0 %v1365_v8  ;;  %p1500_p1 = scmp.ne.s32.totalorder %s1103_s11, %s1499_s12  ;;  %p1505_p3 = scmp.lt.s32.totalorder %s1499_s12, %s1499_s12 }
  0x74   :  { %1050 = vmatprep.subr.bf16.mxu1 %v1368_v9  ;;  %v260_v7 = vrot.slane %v255_v5, %v259_v4  ;;  %v264_v8 = vrot.slane %v255_v5, %v263_v6 }
  0x75   :  { %p1506_p4 = por %p1505_p3, %p1504_p2 }
  0x76   :  { %1008 = vmatpush1.bf16.msra.mxu0 %v1363_v10 }
  0x77   :  { %1051 = vmatpush1.bf16.msra.mxu1 %v1366_v11  ;;  %1009 = vmatprep.subr.bf16.mxu0 %v1371_v12  ;;  %p1507_p5 = pnand %p1506_p4, %p1500_p1 }
  0x78   :  { %1052 = vmatprep.subr.bf16.mxu1 %v1374_v13 }
  0x7a   :  { %1010 = vmatpush1.bf16.msra.mxu0 %v1369_v14 }
  0x7b   :  { %1053 = vmatpush1.bf16.msra.mxu1 %v1372_v15  ;;  %1011 = vmatprep.subr.bf16.mxu0 %v1377_v16 }
  0x7c   :  { %1054 = vmatprep.subr.bf16.mxu1 %v1380_v17 }
  0x7e   :  { %1012 = vmatpush1.bf16.msra.mxu0 %v1375_v18 }
  0x7f   :  { %1055 = vmatpush1.bf16.msra.mxu1 %v1378_v19  ;;  %1013 = vmatprep.subr.bf16.mxu0 %v1383_v20 }
  0x80   :  { %1056 = vmatprep.subr.bf16.mxu1 %v1386_v21 }
  0x82   :  { %1014 = vmatpush1.bf16.msra.mxu0 %v1381_v22 }
  0x83   :  { %1057 = vmatpush1.bf16.msra.mxu1 %v1384_v23  ;;  %1015 = vmatprep.subr.bf16.mxu0 %v1389_v24  ;;  %v267_v23 = vsub.s32 2, %v258_v3  ;;  %v271_v24 = vsub.s32 3, %v258_v3 }
  0x84   :  { %1058 = vmatprep.subr.bf16.mxu1 %v1392_v25 }
  0x85   :  { %v268_v25 = vrot.slane %v255_v5, %v267_v23 }
  0x86   :  { %1016 = vmatpush1.bf16.msra.mxu0 %v1387_v26  ;;  %v272_v26 = vrot.slane %v255_v5, %v271_v24 }
  0x87   :  { %1059 = vmatpush1.bf16.msra.mxu1 %v1390_v27  ;;  %1017 = vmatprep.subr.bf16.mxu0 %v1395_v28 }
  0x88   :  { %1060 = vmatprep.subr.bf16.mxu1 %v1398_v29 }
  0x8a   :  { %1018 = vmatpush1.bf16.msra.mxu0 %v1393_v30 }
  0x8b   :  { %1061 = vmatpush1.bf16.msra.mxu1 %v1396_v31  ;;  %1019 = vmatprep.subr.bf16.mxu0 %v1401_v32 }
  0x8c   :  { %1062 = vmatprep.subr.bf16.mxu1 %v1404_v33 }
  0x8e   :  { %1020 = vmatpush2.bf16.msra.mxu0 %v1399_v34 }
  0x8f   :  { %1063 = vmatpush2.bf16.msra.mxu1 %v1402_v35  ;;  %1021 = vmatprep.subr.bf16.mxu0 %v1407_v36 }
  0x90   :  { %1064 = vmatprep.subr.bf16.mxu1 %v1410_v37 }
  0x92   :  { %1022 = vmatpush2.bf16.msra.mxu0 %v1405_v38 }
  0x93   :  { %1065 = vmatpush2.bf16.msra.mxu1 %v1408_v39  ;;  %1023 = vmatprep.subr.bf16.mxu0 %v1413_v40 }
  0x94   :  { %1066 = vmatprep.subr.bf16.mxu1 %v1416_v41 }
  0x96   :  { %1024 = vmatpush2.bf16.msra.mxu0 %v1411_v42 }
  0x97   :  { %1067 = vmatpush2.bf16.msra.mxu1 %v1414_v43  ;;  %1025 = vmatprep.subr.bf16.mxu0 %v1419_v44 }
  0x98   :  { %1068 = vmatprep.subr.bf16.mxu1 %v1422_v45 }
  0x9a   :  { %1026 = vmatpush2.bf16.msra.mxu0 %v1417_v46 }
  0x9b   :  { %1069 = vmatpush2.bf16.msra.mxu1 %v1420_v47  ;;  %1027 = vmatprep.subr.bf16.mxu0 %v1425_v48 }
  0x9c   :  { %1070 = vmatprep.subr.bf16.mxu1 %v1428_v49 }
  0x9e   :  { %1028 = vmatpush2.bf16.msra.mxu0 %v1423_v50 }
  0x9f   :  { %1071 = vmatpush2.bf16.msra.mxu1 %v1426_v51  ;;  %1029 = vmatprep.subr.bf16.mxu0 %v1431_v52 }
  0xa0   :  { %1072 = vmatprep.subr.bf16.mxu1 %v1434_v53 }
  0xa2   :  { %1030 = vmatpush2.bf16.msra.mxu0 %v1429_v54 }
  0xa3   :  { %1073 = vmatpush2.bf16.msra.mxu1 %v1432_v55  ;;  %1031 = vmatprep.subr.bf16.mxu0 %v1437_v56 }
  0xa4   :  { %1074 = vmatprep.subr.bf16.mxu1 %v1440_v57 }
  0xa6   :  { %1032 = vmatpush2.bf16.msra.mxu0 %v1435_v59 }
  0xa7   :  { %1075 = vmatpush2.bf16.msra.mxu1 %v1438_v58  ;;  %1033 = vmatprep.subr.bf16.mxu0 %v1443_v60 }
  0xa8   :  { %1076 = vmatprep.subr.bf16.mxu1 %v1446_v61 }
  0xaa   :  { %1034 = vmatpush2.bf16.msra.mxu0 %v1441_v62 }
  0xab   :  { %1077 = vmatpush2.bf16.msra.mxu1 %v1444_v63 }
  0xad   :  { %1036 = vmatmul.mubr.bf16.vlgmr.msra.gmra.mxu0 %v1578_v0 }
  0xae   :  { %1079 = vmatmul.mubr.bf16.vlgmr.msra.gmra.mxu1 %v1580_v1 }
 0x12d   :  { %v951_v9 = vpop.f32.mrf.mxu0 }
 0x12e   :  { %v994_v10 = vpop.f32.mrf.mxu1  ;;  %v952_v11 = vadd.f32 %v951_v9, %v260_v7 }
 0x12f   :  { %v953_v12 = vpop.f32.mrf.mxu0 }
 0x130   :  { %v996_v13 = vpop.f32.mrf.mxu1  ;;  %v995_v14 = vadd.f32 %v994_v10, %v952_v11  ;;  %v954_v15 = vadd.f32 %v953_v12, %v264_v8 }
 0x131   :  { %v955_v0 = vpop.f32.mrf.mxu0 }
 0x132   :  { %v998_v16 = vpop.f32.mrf.mxu1  ;;  %1089 = vst [vmem:[#allocation9] sm:$0xff] %v995_v14  ;;  %v997_v1 = vadd.f32 %v996_v13, %v954_v15  ;;  %v956_v17 = vadd.f32 %v955_v0, %v260_v7 }
 0x133   :  { %v957_v18 = vpop.f32.mrf.mxu0 }
 0x134   :  { %1090 = vst [vmem:[#allocation9 + $0x8] sm:$0xff] %v997_v1  ;;  %v999_v19 = vadd.f32 %v998_v16, %v956_v17  ;;  %v958_v20 = vadd.f32 %v957_v18, %v264_v8  ;;  %v1000_v21 = vpop.f32.mrf.mxu1 }
 0x136   :  { %1093 = vst [vmem:[#allocation9 + $0x20] sm:$0xff] %v999_v19  ;;  %v1001_v22 = vadd.f32 %v1000_v21, %v958_v20 }
 0x138   :  { %1094 = vst [vmem:[#allocation9 + $0x28] sm:$0xff] %v1001_v22 }
 0x16d   :  { %v1037_v27 = vpop.f32.mrf.mxu0 }
 0x16e   :  { %v1080_v28 = vpop.f32.mrf.mxu1  ;;  %v1038_v29 = vadd.f32 %v1037_v27, %v268_v25 }
 0x16f   :  { %v1039_v30 = vpop.f32.mrf.mxu0 }
 0x170   :  { %v1082_v31 = vpop.f32.mrf.mxu1  ;;  %v1081_v32 = vadd.f32 %v1080_v28, %v1038_v29  ;;  %v1040_v33 = vadd.f32 %v1039_v30, %v272_v26 }
 0x171   :  { %v1041_v34 = vpop.f32.mrf.mxu0 }
 0x172   :  { %v1084_v35 = vpop.f32.mrf.mxu1  ;;  %1091 = vst [vmem:[#allocation9 + $0x10] sm:$0xff] %v1081_v32  ;;  %v1083_v36 = vadd.f32 %v1082_v31, %v1040_v33  ;;  %v1042_v37 = vadd.f32 %v1041_v34, %v268_v25 }
 0x173   :  { %v1043_v38 = vpop.f32.mrf.mxu0 }
 0x174   :  { %1092 = vst [vmem:[#allocation9 + $0x18] sm:$0xff] %v1083_v36  ;;  %v1085_v39 = vadd.f32 %v1084_v35, %v1042_v37  ;;  %v1044_v40 = vadd.f32 %v1043_v38, %v272_v26  ;;  %v1086_v41 = vpop.f32.mrf.mxu1 }
 0x176   :  { %1095 = vst [vmem:[#allocation9 + $0x30] sm:$0xff] %v1085_v39  ;;  %v1087_v42 = vadd.f32 %v1086_v41, %v1044_v40 }
 0x178   :  { %1096 = vst [vmem:[#allocation9 + $0x38] sm:$0xff] %v1087_v42 }
 0x179   :  { %1510 = shalt.err (!%p1507_p5)
}
 0x17a   :  { %1108 = dma.vmem_to_hbm [thread:$0]  %s1103_s11, 1024, %s1599_s4, [#allocation4], %s1529_s0, %s1529_s0, %s1530_s23  }
 0x17b   :  { %1525 = dma.done.wait [#allocation4], 1024  }
 0x17c   :  { %1526 = vsyncadd [#allocation4], 4294966272 }
 0x17d   :  { %1112 = vsyncpa [#allocation3], 1 }
 0x17e   :  { %1113 = vsyncpa [#allocation8], 1 }
 0x17f   :  { %1114 = vsyncpa [#allocation4], 1 }
 0x180   :  { %1115 = vsyncpa [#allocation5], 1 }

</bundles_post_ra>
